<compile_context>
chip_gen: v7x
topology: tpu7x:2x2x1
jax: 0.10.0
libtpu: 0.0.40
codegen_flags: <defaults>
</compile_context>

<pallas_src>
import jax
import jax.numpy as jnp
from jax.experimental import pallas as pl
from jax.experimental.pallas import tpu as pltpu

_LANE = 128      # f32/bf16 lane width
_SUBLANE = 8     # f32 sublane height


def _round_up(x, m):
    return ((x + m - 1) // m) * m


def mlp_decoder_kernel(x_ref, w1_ref, b1_ref, w2_ref, b2_ref, w3_ref, b3_ref, out_ref):
    # Layer 1: Linear + ReLU.  bf16 operands on the MXU, f32 accumulation,
    # bias-add / ReLU in f32 on the VPU (no bf16 elementwise — v5e-safe).
    h1 = jnp.dot(x_ref[...], w1_ref[...], preferred_element_type=jnp.float32)
    h1 = jnp.maximum(h1 + b1_ref[...], 0.0)

    # TODO(synk): nn.Dropout(p=0.5) is identity in eval mode; training-mode
    # stochastic masking (pltpu.prng_seed / prng_random_bits + 1/(1-p) scale)
    # is intentionally omitted.

    # Layer 2: Linear + ReLU.  Cast only the dot operand down to bf16.
    h2 = jnp.dot(h1.astype(jnp.bfloat16), w2_ref[...],
                 preferred_element_type=jnp.float32)
    h2 = jnp.maximum(h2 + b2_ref[...], 0.0)

    # Reconstructor: Linear.  Store bf16 (HBM-bound regime: halves writeback).
    y = jnp.dot(h2.astype(jnp.bfloat16), w3_ref[...],
                preferred_element_type=jnp.float32)
    out_ref[...] = (y + b3_ref[...]).astype(out_ref.dtype)


def _pad2(a, rows, cols):
    r, c = a.shape
    if r == rows and c == cols:
        return a
    return jnp.pad(a, ((0, rows - r), (0, cols - c)))


def _resident_spec(shape):
    """Constant-index operand: single-buffered (no per-step DMA, half the VMEM)."""
    try:
        return pl.BlockSpec(shape, lambda i: (0, 0), pipeline_mode=pl.Buffered(1))
    except (TypeError, AttributeError):
        # Older JAX without pipeline_mode / Buffered: fall back to default.
        return pl.BlockSpec(shape, lambda i: (0, 0))


def _step_vmem_bytes(tb, in_p, hid_p, out_p, resident_bytes):
    # Double-buffered streamed bf16 x/out tiles + single-buffered resident
    # weights + f32 intermediates (h1, h2, y) + bf16 re-casts of h1/h2.
    stream = 2 * tb * in_p * 2 + 2 * tb * out_p * 2
    interm = 2 * tb * hid_p * 4 + 2 * tb * hid_p * 2 + tb * out_p * 4
    return stream + interm + resident_bytes


def mlp_decoder(x, w1, b1, w2, b2, w3, b3, *, tile_b=1024,
                vmem_budget_bytes=48 << 20):
    """x: (B, input_size). Weights given as (in, out); biases as (1, out).
    Returns (B, 1, output_size) in bf16, matching the module's .view(B, 1, -1)."""
    B, in_size = x.shape
    hid_size = w1.shape[1]
    out_size = w3.shape[1]

    # Pad feature dims to full lanes (lane-dense MXU passes / unmasked stores).
    in_p = _round_up(in_size, _LANE)
    hid_p = _round_up(hid_size, _LANE)
    out_p = _round_up(out_size, _LANE)

    resident_bytes = ((in_p * hid_p + hid_p * hid_p + hid_p * out_p) * 2
                      + (2 * hid_p + out_p) * 4)
    # TODO(synk): if resident_bytes alone exceeds the VMEM budget (very large
    # hidden sizes, esp. on v7x's 64 MiB VMEM), a weight-streaming path with
    # hid/out grid axes + f32 accumulator scratch would be needed.

    # ---- adaptive batch-tile selection ----
    B_sub = _round_up(B, _SUBLANE)
    tb = min(_round_up(max(tile_b, _SUBLANE), _SUBLANE), B_sub)
    # >= 2 grid steps when batch allows it so ("parallel",) can shard the batch
    # across v7x's two TensorCores (harmless no-op on v5e/v6e).
    if B_sub >= 2 * _SUBLANE:
        tb = min(tb, _round_up((B_sub + 1) // 2, _SUBLANE))
    # Shrink while the per-step footprint exceeds the VMEM budget.
    while tb > _SUBLANE and _step_vmem_bytes(
            tb, in_p, hid_p, out_p, resident_bytes) > vmem_budget_bytes:
        tb = _round_up(tb // 2, _SUBLANE)
    # Shrink until batch-padding waste is small (prefer B_p == B_sub exactly,
    # which makes the post-kernel batch slice unnecessary for aligned B).
    while tb > _SUBLANE:
        B_p = _round_up(B, tb)
        if B_p == B_sub or (B_p - B) <= max(B // 8, _SUBLANE):
            break
        tb = _round_up(tb // 2, _SUBLANE)
    B_p = _round_up(B, tb)

    # Zero-padding is exact: padded input columns contribute 0 to every dot,
    # padded hidden units get weight-column 0 + bias 0 -> ReLU(0) = 0,
    # padded output columns are sliced off below (only when padding happened).
    xp = _pad2(x, B_p, in_p).astype(jnp.bfloat16)
    w1p = _pad2(w1, in_p, hid_p).astype(jnp.bfloat16)
    w2p = _pad2(w2, hid_p, hid_p).astype(jnp.bfloat16)
    w3p = _pad2(w3, hid_p, out_p).astype(jnp.bfloat16)
    b1p = _pad2(b1, 1, hid_p).astype(jnp.float32)
    b2p = _pad2(b2, 1, hid_p).astype(jnp.float32)
    b3p = _pad2(b3, 1, out_p).astype(jnp.float32)

    grid = (B_p // tb,)

    flops = 2 * B_p * (in_p * hid_p + hid_p * hid_p + hid_p * out_p)
    bytes_accessed = (
        xp.size * 2
        + (w1p.size + w2p.size + w3p.size) * 2
        + (b1p.size + b2p.size + b3p.size) * 4
        + B_p * out_p * 2   # bf16 output
    )

    vmem_limit = int(min(
        max(2 * _step_vmem_bytes(tb, in_p, hid_p, out_p, resident_bytes),
            8 << 20),
        56 << 20))

    y = pl.pallas_call(
        mlp_decoder_kernel,
        out_shape=jax.ShapeDtypeStruct((B_p, out_p), jnp.bfloat16),
        grid=grid,
        in_specs=[
            pl.BlockSpec((tb, in_p), lambda i: (i, 0)),   # x streams per batch tile
            _resident_spec(w1p.shape), _resident_spec(b1p.shape),
            _resident_spec(w2p.shape), _resident_spec(b2p.shape),
            _resident_spec(w3p.shape), _resident_spec(b3p.shape),
        ],
        out_specs=pl.BlockSpec((tb, out_p), lambda i: (i, 0)),
        compiler_params=pltpu.CompilerParams(
            dimension_semantics=("parallel",),
            vmem_limit_bytes=vmem_limit),
        cost_estimate=pl.CostEstimate(
            flops=flops, transcendentals=0, bytes_accessed=bytes_accessed),
    )(xp, w1p, b1p, w2p, b2p, w3p, b3p)

    # Depad only when we actually padded (otherwise the slice is a needless
    # full HBM pass); the (B, 1, out) view is free metadata.
    if B_p != B or out_p != out_size:
        y = y[:B, :out_size]
    return y.reshape(B, 1, out_size)


def init_params(key, input_size, hidden_size, output_size, dtype=jnp.float32):
    """Deterministic init mirroring nn.Linear shapes (stored transposed: (in, out))."""
    ks = jax.random.split(key, 6)

    def linear(kw, kb, fan_in, fan_out):
        bound = 1.0 / jnp.sqrt(jnp.asarray(fan_in, dtype))
        w = jax.random.uniform(kw, (fan_in, fan_out), dtype, -bound, bound)
        b = jax.random.uniform(kb, (1, fan_out), dtype, -bound, bound)
        return w, b

    w1, b1 = linear(ks[0], ks[1], input_size, hidden_size)
    w2, b2 = linear(ks[2], ks[3], hidden_size, hidden_size)
    w3, b3 = linear(ks[4], ks[5], hidden_size, output_size)
    return w1, b1, w2, b2, w3, b3


if __name__ == "__main__":
    key = jax.random.PRNGKey(0)
    batch, input_size, hidden_size, output_size = 16, 32, 32, 64

    k_x, k_p = jax.random.split(key)
    x = jax.random.normal(k_x, (batch, input_size), jnp.float32)
    params = init_params(k_p, input_size, hidden_size, output_size)

    out = mlp_decoder(x, *params)
    jax.block_until_ready(out)

    # Reference check in plain JAX (f32 math, eval-mode dropout). The kernel
    # uses bf16 MXU operands / bf16 output with f32 accumulation, so tolerance
    # is loose.
    w1, b1, w2, b2, w3, b3 = params
    h1 = jnp.maximum(x @ w1 + b1, 0.0)
    h2 = jnp.maximum(h1 @ w2 + b2, 0.0)
    ref = (h2 @ w3 + b3).reshape(batch, 1, output_size)

    assert out.shape == (batch, 1, output_size)
    out_f32 = out.astype(jnp.float32)
    assert jnp.allclose(out_f32, ref, atol=1e-1, rtol=1e-1), (
        f"max abs diff {jnp.max(jnp.abs(out_f32 - ref))}")
    print("KERNEL_OK")
</pallas_src>

<mosaic_0001>
module attributes {stable_mosaic.version = 11 : i64} {
  func.func @mlp_decoder_kernel(%arg0: i32, %arg1: memref<8x128xbf16, #tpu.memory_space<vmem>>, %arg2: memref<128x128xbf16, #tpu.memory_space<vmem>>, %arg3: memref<1x128xf32, #tpu.memory_space<vmem>>, %arg4: memref<128x128xbf16, #tpu.memory_space<vmem>>, %arg5: memref<1x128xf32, #tpu.memory_space<vmem>>, %arg6: memref<128x128xbf16, #tpu.memory_space<vmem>>, %arg7: memref<1x128xf32, #tpu.memory_space<vmem>>, %arg8: memref<8x128xbf16, #tpu.memory_space<vmem>>) attributes {dimension_semantics = [#tpu.dimension_semantics<parallel>], iteration_bounds = array<i64: 2>, scalar_prefetch = 0 : i64, scratch_operands = 0 : i64, tpu.core_type = #tpu.core_type<tc>, window_params = [{transform_indices = @transform_0, window_bounds = array<i64: 8, 128>}, {pipeline_mode = #tpu.pipeline_mode<synchronous>, transform_indices = @transform_1, window_bounds = array<i64: 128, 128>}, {pipeline_mode = #tpu.pipeline_mode<synchronous>, transform_indices = @transform_2, window_bounds = array<i64: 1, 128>}, {pipeline_mode = #tpu.pipeline_mode<synchronous>, transform_indices = @transform_3, window_bounds = array<i64: 128, 128>}, {pipeline_mode = #tpu.pipeline_mode<synchronous>, transform_indices = @transform_4, window_bounds = array<i64: 1, 128>}, {pipeline_mode = #tpu.pipeline_mode<synchronous>, transform_indices = @transform_5, window_bounds = array<i64: 128, 128>}, {pipeline_mode = #tpu.pipeline_mode<synchronous>, transform_indices = @transform_6, window_bounds = array<i64: 1, 128>}, {transform_indices = @transform_7, window_bounds = array<i64: 8, 128>}]} {
    %c0 = arith.constant 0 : index
    %c0_0 = arith.constant 0 : index
    %0 = vector.load %arg1[%c0, %c0_0] : memref<8x128xbf16, #tpu.memory_space<vmem>>, vector<8x128xbf16>
    %c0_1 = arith.constant 0 : index
    %c0_2 = arith.constant 0 : index
    %1 = vector.load %arg2[%c0_1, %c0_2] : memref<128x128xbf16, #tpu.memory_space<vmem>>, vector<128x128xbf16>
    %cst = arith.constant dense<0.000000e+00> : vector<8x128xf32>
    %2 = tpu.matmul %0, %1, %cst {dimension_numbers = #tpu.dot_dimension_numbers<[1], [0], [0], [1], [0, 0, 1, 1], [], []>} : vector<8x128xbf16>, vector<128x128xbf16>, vector<8x128xf32> -> vector<8x128xf32>
    %c0_3 = arith.constant 0 : index
    %c0_4 = arith.constant 0 : index
    %3 = vector.load %arg3[%c0_3, %c0_4] : memref<1x128xf32, #tpu.memory_space<vmem>>, vector<1x128xf32>
    %4 = vector.broadcast %3 : vector<1x128xf32> to vector<8x128xf32>
    %5 = arith.addf %2, %4 : vector<8x128xf32>
    %cst_5 = arith.constant 0.000000e+00 : f32
    %6 = vector.broadcast %cst_5 : f32 to vector<8x128xf32>
    %7 = arith.maximumf %5, %6 : vector<8x128xf32>
    %8 = arith.truncf %7 : vector<8x128xf32> to vector<8x128xbf16>
    %c0_6 = arith.constant 0 : index
    %c0_7 = arith.constant 0 : index
    %9 = vector.load %arg4[%c0_6, %c0_7] : memref<128x128xbf16, #tpu.memory_space<vmem>>, vector<128x128xbf16>
    %cst_8 = arith.constant dense<0.000000e+00> : vector<8x128xf32>
    %10 = tpu.matmul %8, %9, %cst_8 {dimension_numbers = #tpu.dot_dimension_numbers<[1], [0], [0], [1], [0, 0, 1, 1], [], []>} : vector<8x128xbf16>, vector<128x128xbf16>, vector<8x128xf32> -> vector<8x128xf32>
    %c0_9 = arith.constant 0 : index
    %c0_10 = arith.constant 0 : index
    %11 = vector.load %arg5[%c0_9, %c0_10] : memref<1x128xf32, #tpu.memory_space<vmem>>, vector<1x128xf32>
    %12 = vector.broadcast %11 : vector<1x128xf32> to vector<8x128xf32>
    %13 = arith.addf %10, %12 : vector<8x128xf32>
    %cst_11 = arith.constant 0.000000e+00 : f32
    %14 = vector.broadcast %cst_11 : f32 to vector<8x128xf32>
    %15 = arith.maximumf %13, %14 : vector<8x128xf32>
    %16 = arith.truncf %15 : vector<8x128xf32> to vector<8x128xbf16>
    %c0_12 = arith.constant 0 : index
    %c0_13 = arith.constant 0 : index
    %17 = vector.load %arg6[%c0_12, %c0_13] : memref<128x128xbf16, #tpu.memory_space<vmem>>, vector<128x128xbf16>
    %cst_14 = arith.constant dense<0.000000e+00> : vector<8x128xf32>
    %18 = tpu.matmul %16, %17, %cst_14 {dimension_numbers = #tpu.dot_dimension_numbers<[1], [0], [0], [1], [0, 0, 1, 1], [], []>} : vector<8x128xbf16>, vector<128x128xbf16>, vector<8x128xf32> -> vector<8x128xf32>
    %c0_15 = arith.constant 0 : index
    %c0_16 = arith.constant 0 : index
    %19 = vector.load %arg7[%c0_15, %c0_16] : memref<1x128xf32, #tpu.memory_space<vmem>>, vector<1x128xf32>
    %20 = vector.broadcast %19 : vector<1x128xf32> to vector<8x128xf32>
    %21 = arith.addf %18, %20 : vector<8x128xf32>
    %22 = arith.truncf %21 : vector<8x128xf32> to vector<8x128xbf16>
    %c0_17 = arith.constant 0 : index
    %c0_18 = arith.constant 0 : index
    %23 = vector.load %arg8[%c0_17, %c0_18] : memref<8x128xbf16, #tpu.memory_space<vmem>>, vector<8x128xbf16>
    tpu.vector_store %arg8[%c0_17, %c0_18], %22 {strides = array<i32>} : memref<8x128xbf16, #tpu.memory_space<vmem>>, vector<8x128xbf16>,
    return
  }
  func.func @transform_0(%arg0: i32) -> (i32, i32) {
    %c0_i32 = arith.constant 0 : i32
    %c0_i32_0 = arith.constant 0 : i32
    return %arg0, %c0_i32 : i32, i32
  }
  func.func @transform_1(%arg0: i32) -> (i32, i32) {
    %c0_i32 = arith.constant 0 : i32
    %c0_i32_0 = arith.constant 0 : i32
    %c0_i32_1 = arith.constant 0 : i32
    return %c0_i32, %c0_i32_0 : i32, i32
  }
  func.func @transform_2(%arg0: i32) -> (i32, i32) {
    %c0_i32 = arith.constant 0 : i32
    %c0_i32_0 = arith.constant 0 : i32
    %c0_i32_1 = arith.constant 0 : i32
    return %c0_i32, %c0_i32_0 : i32, i32
  }
  func.func @transform_3(%arg0: i32) -> (i32, i32) {
    %c0_i32 = arith.constant 0 : i32
    %c0_i32_0 = arith.constant 0 : i32
    %c0_i32_1 = arith.constant 0 : i32
    return %c0_i32, %c0_i32_0 : i32, i32
  }
  func.func @transform_4(%arg0: i32) -> (i32, i32) {
    %c0_i32 = arith.constant 0 : i32
    %c0_i32_0 = arith.constant 0 : i32
    %c0_i32_1 = arith.constant 0 : i32
    return %c0_i32, %c0_i32_0 : i32, i32
  }
  func.func @transform_5(%arg0: i32) -> (i32, i32) {
    %c0_i32 = arith.constant 0 : i32
    %c0_i32_0 = arith.constant 0 : i32
    %c0_i32_1 = arith.constant 0 : i32
    return %c0_i32, %c0_i32_0 : i32, i32
  }
  func.func @transform_6(%arg0: i32) -> (i32, i32) {
    %c0_i32 = arith.constant 0 : i32
    %c0_i32_0 = arith.constant 0 : i32
    %c0_i32_1 = arith.constant 0 : i32
    return %c0_i32, %c0_i32_0 : i32, i32
  }
  func.func @transform_7(%arg0: i32) -> (i32, i32) {
    %c0_i32 = arith.constant 0 : i32
    %c0_i32_0 = arith.constant 0 : i32
    return %arg0, %c0_i32 : i32, i32
  }
}

</mosaic_0001>

<bundles_post_ra>
// kernel: tpu_custom_call.1
= control target key start
LH: loop header
LB: loop body
LE: loop exit
PB: predicated region body
PF: predicated region fallthrough
CT: control target
= control target key end

     0   :  { %12 = vsyncpa [#allocation3], 0  ;;  %s1577_s0 = inlined_call_operand.hbm [shape: bf16[16,128], index: 0, kind: input, shape index: {}]   ;;  %s1578_s1 = inlined_call_operand.hbm [shape: bf16[128,128], index: 1, kind: input, shape index: {}]   ;;  %s1579_s2 = inlined_call_operand.vmem [shape: f32[1,128], index: 2, kind: input, shape index: {}]   ;;  %s1580_s3 = inlined_call_operand.hbm [shape: bf16[128,128], index: 3, kind: input, shape index: {}]   ;;  %s1581_s4 = inlined_call_operand.vmem [shape: f32[1,128], index: 4, kind: input, shape index: {}]   ;;  %s1582_s5 = inlined_call_operand.hbm [shape: bf16[128,128], index: 5, kind: input, shape index: {}]   ;;  %s1583_s6 = inlined_call_operand.vmem [shape: f32[1,128], index: 6, kind: input, shape index: {}]   ;;  %s1584_s7 = inlined_call_operand.hbm [shape: bf16[16,128], index: 7, kind: output, shape index: {}]  }
   0x1   :  { %14 = vsyncpa [#allocation3 + $0x1], 0 }
   0x2   :  { %15 = vsyncpa [#allocation6], 0 }
   0x3   :  { %16 = vsyncpa [#allocation9], 0 }
   0x4   :  { %17 = vsyncpa [#allocation4], 0 }
   0x5   :  { %19 = vsyncpa [#allocation4 + $0x1], 0  ;;  %s1268_s24 = smov 0   ;;  %s1270_s25 = smov 0  }
   0x6   :  { %s1272_s26 = smov 0   ;;  %s1274_s27 = smov 0  }
   0x7 LB: > { %s1289_s28 = sadd.s32 4294967295, %s1217_s27   ;;  %s792_s29 = sadd.s32 4294967294, %s1217_s27   ;;  %s1217_s27 = sphi %s1274_s27, %s1610_s27   ;;  %s1213_s26 = sphi %s1272_s26, %s1609_s26   ;;  %s1209_s25 = sphi %s1270_s25, %s1608_s25   ;;  %s1205_s24 = sphi %s1268_s24, %s1607_s24  }
   0x8   : > { %p45_p0 = scmp.ne.s32.totalorder %s1209_s25, %s1205_s24  ;;  %p1585_p1 = scmp.eq.s32.totalorder %s1289_s28, 0 }
   0x9   : > { %p201_p3 = scmp.eq.s32.totalorder %s792_s29, 1  ;;  %p793_p5 = scmp.ge.s32.totalorder %s1217_s27, 1 }
   0xa   : > { %p1298_p4 = por %p1585_p1, %p45_p0  ;;  %p208_p7 = scmp.lt.s32.totalorder %s1217_s27, 3 }
   0xb   : > { %p1303_p6 = por %p201_p3, %p45_p0  ;;  %s1219_s10 = smov [#allocation5]  }
   0xc   : > { %s1589_s30 = scalar_select %p1298_p4, 1, 0 }
   0xd   : > { %s1590_s8 = scalar_select %p1303_p6, 1, 0 }
   0xe   : > { %p1308_p8 = pnand %p793_p5, %p208_p7  ;;  %s220_s11 = sshll.u32 %s1219_s10, 4  ;;  %s1312_s11 = int_to_ptr.vmem [resolvable:$true] %s220_s11 }
   0xf   : > { %1591 = sst [smem:[#allocation15_spill]] %s1590_s8  ;;  %s1220_s13 = smov [#allocation7]  }
  0x10   : > { %s1592_s9 = scalar_select %p1308_p8, 1, 0 }
  0x11   : > { %p940_p9 = pneg %p1308_p8  ;;  %s236_s14 = sshll.u32 %s1220_s13, 4  ;;  %s1323_s14 = int_to_ptr.vmem [resolvable:$true] %s236_s14 }
  0x12   : > { %s1221_s15 = smov [#allocation8]   ;;  %s1029_s19 = scalar_lea.hbm %s1578_s1, 1024 }
  0x13   : > { %p1319_p11 = pnand %p940_p9, %p1585_p1  ;;  %s1325_s16 = sshll.u32 %s1221_s15, 4  ;;  %s253_s16 = int_to_ptr.vmem [resolvable:$true] %s1325_s16 }
  0x14   : > { %p1030_p12 = scmp.ne.s32.totalorder %s1578_s1, %s1029_s19  ;;  %p1036_p5 = scmp.lt.u32.totalorder %s1029_s19, %s1578_s1 }
  0x15   : > { %p1335_p13 = pneg %p1319_p11 }
  0x17   : > { %p1032_p0 = pnand %p1335_p13, %p1030_p12 }
  0x19   : > { %p1033_p3 = pneg %p1032_p0 }
  0x1b   : > { %p1038_p7 = pnand %p1036_p5, %p1033_p3 }
  0x1d   : > { %1041 = shalt.err (!%p1038_p7)
}
  0x1e   : > { %s1042_s10 = scalar_lea.vmem %s1312_s11, 1024  ;;  %p1050_p2 = scmp.lt.s32.totalorder %s1312_s11, %s1312_s11 }
  0x1f   : > { %p1043_p9 = scmp.ne.s32.totalorder %s1312_s11, %s1042_s10  ;;  %p1051_p6 = scmp.lt.s32.totalorder %s1042_s10, %s1042_s10 }
  0x21   : > { %p1045_p10 = pnand %p1043_p9, %p1335_p13  ;;  %p1052_p12 = por %p1051_p6, %p1050_p2 }
  0x23   : > { %p1046_p1 = pneg %p1045_p10 }
  0x25   : > { %p1053_p0 = pnand %p1052_p12, %p1046_p1 }
  0x27   : > { %1056 = shalt.err (!%p1053_p0)
}
  0x28   : > { %s1222_s13 = smov 64   ;;  %s1223_s15 = smov 4  }
  0x29   : > { %943 = dma.hbm_to_vmem [thread:$0]  (!%p1319_p11), %s1578_s1, 1024, %s1312_s11, [#allocation6], %s1222_s13, %s1222_s13, %s1223_s15  }
  0x2a   : > { %s1057_s21 = scalar_lea.hbm %s1580_s3, 1024 }
  0x2b   : > { %p1058_p1 = scmp.ne.s32.totalorder %s1580_s3, %s1057_s21  ;;  %p1064_p10 = scmp.lt.u32.totalorder %s1057_s21, %s1580_s3 }
  0x2d   : > { %p1060_p2 = pnand %p1058_p1, %p1335_p13 }
  0x2f   : > { %p1061_p6 = pneg %p1060_p2 }
  0x31   : > { %p1066_p3 = pnand %p1064_p10, %p1061_p6 }
  0x33   : > { %1069 = shalt.err (!%p1066_p3)
}
  0x34   : > { %s1070_s11 = scalar_lea.vmem %s1323_s14, 1024  ;;  %p1078_p12 = scmp.lt.s32.totalorder %s1323_s14, %s1323_s14 }
  0x35   : > { %p1071_p5 = scmp.ne.s32.totalorder %s1323_s14, %s1070_s11  ;;  %p1079_p0 = scmp.lt.s32.totalorder %s1070_s11, %s1070_s11 }
  0x37   : > { %p1073_p7 = pnand %p1071_p5, %p1335_p13  ;;  %p1080_p1 = por %p1079_p0, %p1078_p12 }
  0x39   : > { %p1074_p9 = pneg %p1073_p7 }
  0x3b   : > { %p1081_p2 = pnand %p1080_p1, %p1074_p9 }
  0x3d   : > { %1084 = shalt.err (!%p1081_p2)
}
  0x3e   : > { %946 = dma.hbm_to_vmem [thread:$0]  (!%p1319_p11), %s1580_s3, 1024, %s1323_s14, [#allocation6], %s1222_s13, %s1222_s13, %s1223_s15  }
  0x3f   : > { %s1085_s20 = scalar_lea.hbm %s1582_s5, 1024 }
  0x40   : > { %p1086_p6 = scmp.ne.s32.totalorder %s1582_s5, %s1085_s20  ;;  %p1092_p5 = scmp.lt.u32.totalorder %s1085_s20, %s1582_s5 }
  0x42   : > { %p1088_p10 = pnand %p1086_p6, %p1335_p13 }
  0x44   : > { %p1089_p3 = pneg %p1088_p10 }
  0x46   : > { %p1094_p7 = pnand %p1092_p5, %p1089_p3 }
  0x48   : > { %1097 = shalt.err (!%p1094_p7)
}
  0x49   : > { %s1098_s11 = scalar_lea.vmem %s253_s16, 1024  ;;  %p1106_p1 = scmp.lt.s32.totalorder %s253_s16, %s253_s16 }
  0x4a   : > { %p1099_p9 = scmp.ne.s32.totalorder %s253_s16, %s1098_s11  ;;  %p1107_p2 = scmp.lt.s32.totalorder %s1098_s11, %s1098_s11 }
  0x4c   : > { %p1101_p12 = pnand %p1099_p9, %p1335_p13  ;;  %p1108_p4 = por %p1107_p2, %p1106_p1 }
  0x4e   : > { %p1102_p0 = pneg %p1101_p12 }
  0x50   : > { %p1109_p8 = pnand %p1108_p4, %p1102_p0 }
  0x52   : > { %1112 = shalt.err (!%p1109_p8)
}
  0x53   : > { %949 = dma.hbm_to_vmem [thread:$0]  (!%p1319_p11), %s1582_s5, 1024, %s253_s16, [#allocation9], %s1222_s13, %s1222_s13, %s1223_s15  }
  0x54   : > { %s1408_s22 = sadd.s32 1, %s1217_s27   ;;  %s32_s17 = sadd.s32 1, %s1213_s26 }
  0x55   : > { %s29_s12 = ssub.s32 %s1217_s27, %s1408_s22  ;;  %p39_p8 = scmp.ne.s32.totalorder %s1213_s26, %s1209_s25 }
  0x56   : > { %p30_p4 = scmp.eq.s32.totalorder %s29_s12, 0  ;;  %p40_p13 = scmp.eq.s32.totalorder %s1217_s27, 0 }
  0x57   : > { %p961_p6 = scmp.lt.s32.totalorder %s1217_s27, 2  ;;  %p1595_p3 = scmp.eq.s32.totalorder %s1289_s28, 1 }
  0x58   : > { %s1418_s18 = scalar_select %p30_p4, %s1213_s26, %s32_s17  }
  0x59   : > { %p41_p10 = por %p40_p13, %p39_p8  ;;  %p1422_p5 = por %p1595_p3, %p39_p8 }
  0x5a   : > { %s269_s20 = sand.u32 1, %s1213_s26   ;;  %s799_s21 = sshll.u32 %s1217_s27, 6 }
  0x5b   : > { %s798_s16 = sshll.u32 %s269_s20, 2  ;;  %s1431_s23 = scalar_lea.hbm %s1577_s0, %s799_s21 }
  0x5c   : > { %s273_s29 = scalar_lea.vmem [#allocation2], %s798_s16  ;;  %p1433_p11 = pnand %p961_p6, %p41_p10 }
  0x5d   : > { %s280_s10 = sshll.u32 %s273_s29, 4  ;;  %s270_s14 = scalar_lea.sflag [#allocation3], %s269_s20  ;;  %s1437_s10 = int_to_ptr.vmem [resolvable:$true] %s280_s10 }
  0x5e   : > { %s1113_s8 = scalar_lea.hbm %s1431_s23, 64  ;;  %p1115_p9 = pneg %p1433_p11 }
  0x5f   : > { %p1114_p7 = scmp.ne.s32.totalorder %s1431_s23, %s1113_s8  ;;  %s1118_s21 = scalar_lea.hbm %s1577_s0, 128 }
  0x60   : > { %p1119_p1 = scmp.lt.u32.totalorder %s1431_s23, %s1577_s0  ;;  %p1120_p2 = scmp.lt.u32.totalorder %s1118_s21, %s1113_s8 }
  0x61   : > { %p1116_p12 = pnand %p1115_p9, %p1114_p7  ;;  %p1122_p8 = scmp.lt.u32.totalorder %s1113_s8, %s1431_s23 }
  0x62   : > { %p1121_p4 = por %p1120_p2, %p1119_p1 }
  0x63   : > { %p1117_p0 = pneg %p1116_p12 }
  0x64   : > { %p1123_p13 = por %p1122_p8, %p1121_p4 }
  0x66   : > { %p1124_p6 = pnand %p1123_p13, %p1117_p0 }
  0x68   : > { %1127 = shalt.err (!%p1124_p6)
}
  0x69   : > { %s1128_s20 = scalar_lea.vmem %s1437_s10, 64  ;;  %s1224_s15 = smov [#allocation2]  }
  0x6a   : > { %p1129_p10 = scmp.ne.s32.totalorder %s1437_s10, %s1128_s20  ;;  %s1133_s29 = sshll.u32 %s1224_s15, 4  ;;  %s1134_s29 = int_to_ptr.vmem [resolvable:$false] %s1133_s29 }
  0x6b   : > { %s1135_s12 = scalar_lea.vmem %s1134_s29, 128  ;;  %p1136_p12 = scmp.lt.s32.totalorder %s1437_s10, %s1134_s29 }
  0x6c   : > { %p1131_p3 = pnand %p1129_p10, %p1115_p9  ;;  %p1137_p1 = scmp.lt.s32.totalorder %s1135_s12, %s1128_s20 }
  0x6e   : > { %p1132_p7 = pneg %p1131_p3  ;;  %p1138_p2 = por %p1137_p1, %p1136_p12 }
  0x70   : > { %p1139_p4 = pnand %p1138_p2, %p1132_p7 }
  0x72   : > { %1142 = shalt.err (!%p1139_p4)
}
  0x73   : > { %953 = dma.hbm_to_vmem [thread:$0]  (!%p1433_p11), %s1431_s23, 64, %s1437_s10, %s270_s14  }
  0x74   : > { %p1598_p0 = scmp.ne.s32.totalorder %s1592_s9, 0 }
  0x75   : > { %s1467_s8 = sand.u32 (!%p1598_p0), 1, %s1209_s25   ;;  %p1599_p9 = scmp.ne.s32.totalorder (!%p1598_p0), %s1589_s30, 0 }
  0x76   : > { %289 = sbr.rel (%p1598_p0) target bundleno = 833 (0x341), region = 48  ;;  %s801_s17 = sshll.u32 (!%p1598_p0), %s1467_s8, 2 }
  0x77   : > { %s292_s21 = scalar_lea.sflag (!%p1598_p0), [#allocation3], %s1467_s8  ;;  %s1473_s16 = scalar_lea.vmem (!%p1598_p0), [#allocation2], %s801_s17 }
  0x7d   : > { %1188 = dma.done.wait (%p1599_p9), %s292_s21, 64  }
  0x7e   : > { %1190 = vsyncadd (%p1599_p9), %s292_s21, 4294967232  ;;  %p1600_p11 = scmp.eq.s32.totalorder %s1289_s28, 0 }
  0x80   : > { %1192 = dma.done.wait (%p1600_p11), [#allocation6], 2048   ;;  %p1601_p8 = pmov %p1600_p11 }
  0x82   : > { %1194 = vsyncadd (%p1601_p8), [#allocation6], 4294965248  ;;  %p1602_p13 = pmov %p1601_p8 }
  0x83   : > { %p1603_p6 = pmov %p1601_p8 }
  0x84   : > { %1196 = dma.done.wait (%p1602_p13), [#allocation9], 1024  }
  0x85   : > { %1198 = vsyncadd (%p1603_p6), [#allocation9], 4294966272  ;;  %v1225_v0 = vmov 0.0   ;;  %vm1226_vm0 = vmmov 0   ;;  %v1005_v1 = vld [vmem:[#allocation5] sm:$0xff]   ;;  %v1006_v2 = vld [vmem:[#allocation5 + $0x8] sm:$0xff]  }
  0x86   : > { %864 = vmatprep.subr.bf16.mxu0 %v1225_v0  ;;  %880 = vmatprep.mubr.msk.bf16.mxu0 %vm1226_vm0, %v1225_v0  ;;  %v1007_v3 = vld [vmem:[#allocation5 + $0x10] sm:$0xff]   ;;  %v1013_v4 = vld [vmem:[#allocation7] sm:$0xff]   ;;  %v1008_v5 = vld [vmem:[#allocation5 + $0x18] sm:$0xff]   ;;  %s834_s13 = sshll.u32 %s1289_s28, 6  ;;  %s337_s20 = scalar_lea.vmem [#allocation10], %s801_s17 }
  0x87   : > { %884 = vmatprep.subr.bf16.mxu1 %v1225_v0  ;;  %900 = vmatprep.mubr.msk.bf16.mxu1 %vm1226_vm0, %v1225_v0  ;;  %v1014_v6 = vld [vmem:[#allocation7 + $0x8] sm:$0xff]   ;;  %v1009_v7 = vld [vmem:[#allocation5 + $0x20] sm:$0xff]   ;;  %v1015_v8 = vld [vmem:[#allocation7 + $0x10] sm:$0xff]   ;;  %s693_s15 = sshll.u32 %s337_s20, 4  ;;  %s1533_s21 = scalar_lea.hbm %s1584_s7, %s834_s13  ;;  %s1535_s15 = int_to_ptr.vmem [resolvable:$true] %s693_s15 }
  0x88   : > { %865 = vmatpush3.bf16.msra.mxu0 %v1005_v1  ;;  %885 = vmatpush3.bf16.msra.mxu1 %v1013_v4  ;;  %v1010_v9 = vld [vmem:[#allocation5 + $0x28] sm:$0xff]   ;;  %v1016_v10 = vld [vmem:[#allocation7 + $0x18] sm:$0xff]   ;;  %v1011_v11 = vld [vmem:[#allocation5 + $0x30] sm:$0xff]   ;;  %s680_s28 = scalar_lea.sflag [#allocation4], %s1467_s8  ;;  %s1227_s17 = smov [#allocation10]  }
  0x89   : > { %866 = vmatprep.subr.bf16.mxu0 %v1225_v0  ;;  %886 = vmatprep.subr.bf16.mxu1 %v1225_v0  ;;  %v1017_v12 = vld [vmem:[#allocation7 + $0x20] sm:$0xff]   ;;  %v1012_v13 = vld [vmem:[#allocation5 + $0x38] sm:$0xff]   ;;  %v1018_v14 = vld [vmem:[#allocation7 + $0x28] sm:$0xff]   ;;  %s1147_s30 = sshll.u32 %s1227_s17, 4  ;;  %s1148_s30 = int_to_ptr.vmem [resolvable:$false] %s1147_s30 }
  0x8a   : > { %v339_v15 = vld [vmem:[%s1473_s16] sm:$0xf]  ;;  %v1019_v16 = vld [vmem:[#allocation7 + $0x30] sm:$0xff]   ;;  %v1021_v18 = vld [vmem:[#allocation8] sm:$0xff]   ;;  %s1143_s16 = scalar_lea.vmem %s1535_s15, 64  ;;  %s1149_s9 = scalar_lea.vmem %s1148_s30, 128 }
  0x8b   : > { %v1020_v17 = vld [vmem:[#allocation7 + $0x38] sm:$0xff]   ;;  %v1022_v19 = vld [vmem:[#allocation8 + $0x8] sm:$0xff]   ;;  %v1023_v20 = vld [vmem:[#allocation8 + $0x10] sm:$0xff]   ;;  %p1144_p10 = scmp.ne.s32.totalorder %s1535_s15, %s1143_s16  ;;  %p1150_p12 = scmp.lt.s32.totalorder %s1535_s15, %s1148_s30 }
  0x8c   : > { %867 = vmatpush3.bf16.msra.mxu0 %v1006_v2  ;;  %887 = vmatpush3.bf16.msra.mxu1 %v1014_v6  ;;  %v1024_v21 = vld [vmem:[#allocation8 + $0x18] sm:$0xff]   ;;  %v1025_v22 = vld [vmem:[#allocation8 + $0x20] sm:$0xff]   ;;  %v1026_v23 = vld [vmem:[#allocation8 + $0x28] sm:$0xff]   ;;  %p1151_p1 = scmp.lt.s32.totalorder %s1149_s9, %s1143_s16 }
  0x8d   : > { %868 = vmatprep.subr.bf16.mxu0 %v1225_v0  ;;  %888 = vmatprep.subr.bf16.mxu1 %v1225_v0  ;;  %v806_v24 = vld [vmem:[%s1579_s2] ss:$0 sm:$0xff]  ;;  %v1027_v32 = vld [vmem:[#allocation8 + $0x30] sm:$0xff]   ;;  %p1145_p3 = pnand %p1144_p10, %p1422_p5 }
  0x8e   : > { %v1028_v33 = vld [vmem:[#allocation8 + $0x38] sm:$0xff]   ;;  %p1152_p2 = por %p1151_p1, %p1150_p12 }
  0x8f   : > { %v815_v34 = vld [vmem:[%s1581_s4] ss:$0 sm:$0xff]  ;;  %p1146_p7 = pneg %p1145_p3 }
  0x90   : > { %869 = vmatpush3.bf16.msra.mxu0 %v1007_v3  ;;  %889 = vmatpush3.bf16.msra.mxu1 %v1015_v8  ;;  %v824_v42 = vld [vmem:[%s1583_s6] ss:$0 sm:$0xff] }
  0x91   : > { %870 = vmatprep.subr.bf16.mxu0 %v1225_v0  ;;  %890 = vmatprep.subr.bf16.mxu1 %v1225_v0  ;;  %p1153_p4 = pnand %p1152_p2, %p1146_p7 }
  0x94   : > { %871 = vmatpush3.bf16.msra.mxu0 %v1008_v5  ;;  %891 = vmatpush3.bf16.msra.mxu1 %v1016_v10 }
  0x95   : > { %872 = vmatprep.subr.bf16.mxu0 %v1225_v0  ;;  %892 = vmatprep.subr.bf16.mxu1 %v1225_v0 }
  0x98   : > { %873 = vmatpush3.bf16.msra.mxu0 %v1009_v7  ;;  %893 = vmatpush3.bf16.msra.mxu1 %v1017_v12 }
  0x99   : > { %874 = vmatprep.subr.bf16.mxu0 %v1225_v0  ;;  %894 = vmatprep.subr.bf16.mxu1 %v1225_v0 }
  0x9c   : > { %875 = vmatpush3.bf16.msra.mxu0 %v1010_v9  ;;  %895 = vmatpush3.bf16.msra.mxu1 %v1018_v14 }
  0x9d   : > { %876 = vmatprep.subr.bf16.mxu0 %v1225_v0  ;;  %896 = vmatprep.subr.bf16.mxu1 %v1225_v0 }
  0xa0   : > { %877 = vmatpush3.bf16.msra.mxu0 %v1011_v11  ;;  %897 = vmatpush3.bf16.msra.mxu1 %v1019_v16 }
  0xa1   : > { %878 = vmatprep.subr.bf16.mxu0 %v1225_v0  ;;  %898 = vmatprep.subr.bf16.mxu1 %v1225_v0 }
  0xa4   : > { %879 = vmatpush3.bf16.msra.mxu0 %v1012_v13  ;;  %899 = vmatpush3.bf16.msra.mxu1 %v1020_v17 }
  0xa5   : > { %904 = vmatprep.subr.bf16.mxu0 %v1225_v0 }
  0xa7   : > { %881 = vmatmul.mubr.bf16.vlgmr.msra.gmra.mrb[0].mxu0 %v339_v15 }
  0xa8   : > { %920 = vmatprep.mubr.msk.bf16.mxu0 %vm1226_vm0, %v1225_v0  ;;  %905 = vmatpush3.bf16.msra.mxu0 %v1021_v18 }
  0xa9   : > { %906 = vmatprep.subr.bf16.mxu0 %v1225_v0 }
  0xac   : > { %907 = vmatpush3.bf16.msra.mxu0 %v1022_v19 }
  0xad   : > { %908 = vmatprep.subr.bf16.mxu0 %v1225_v0 }
  0xb0   : > { %909 = vmatpush3.bf16.msra.mxu0 %v1023_v20 }
  0xb1   : > { %910 = vmatprep.subr.bf16.mxu0 %v1225_v0 }
  0xb4   : > { %911 = vmatpush3.bf16.msra.mxu0 %v1024_v21 }
  0xb5   : > { %912 = vmatprep.subr.bf16.mxu0 %v1225_v0 }
  0xb8   : > { %913 = vmatpush3.bf16.msra.mxu0 %v1025_v22 }
  0xb9   : > { %914 = vmatprep.subr.bf16.mxu0 %v1225_v0 }
  0xbc   : > { %915 = vmatpush3.bf16.msra.mxu0 %v1026_v23 }
  0xbd   : > { %916 = vmatprep.subr.bf16.mxu0 %v1225_v0 }
  0xc0   : > { %917 = vmatpush3.bf16.msra.mxu0 %v1027_v32 }
  0xc1   : > { %918 = vmatprep.subr.bf16.mxu0 %v1225_v0 }
  0xc4   : > { %919 = vmatpush3.bf16.msra.mxu0 %v1028_v33 }
 0x17a   : > { %v445_v25 = vpop.f32.mrb[0].mxu0 }
 0x17b   : > { %v446_v26 = vadd.f32 %v806_v24, %v445_v25  ;;  %v882_v27 = vpop.f32.mrb[1].mxu0 }
 0x17c   : > { %v448_v28 = vpop.f32.mrb[2].mxu0 }
 0x17d   : > { %v451_v29 = vmax.f32 %v446_v26, 0.0  ;;  %v883_v30 = vpop.f32.mrb[3].mxu0 }
 0x17f   : > { %v452_v31 = vpack.c.bf16 %v451_v29, %v451_v29 }
 0x181   : > { %901 = vmatmul.mubr.bf16.vlgmr.msra.gmra.mrb[0].mxu1 %v452_v31 }
 0x254   : > { %v558_v35 = vpop.f32.mrb[0].mxu1 }
 0x255   : > { %v559_v36 = vadd.f32 %v815_v34, %v558_v35  ;;  %v902_v37 = vpop.f32.mrb[1].mxu1 }
 0x256   : > { %v561_v38 = vpop.f32.mrb[2].mxu1 }
 0x257   : > { %v564_v39 = vmax.f32 %v559_v36, 0.0  ;;  %v903_v40 = vpop.f32.mrb[3].mxu1 }
 0x259   : > { %v565_v41 = vpack.c.bf16 %v564_v39, %v564_v39 }
 0x25b   : > { %921 = vmatmul.mubr.bf16.vlgmr.msra.gmra.mrb[4].mxu0 %v565_v41 }
 0x32e   : > { %v671_v43 = vpop.f32.mrb[4].mxu0 }
 0x32f   : > { %v672_v44 = vadd.f32 %v824_v42, %v671_v43  ;;  %v922_v45 = vpop.f32.mrb[5].mxu0 }
 0x330   : > { %v674_v46 = vpop.f32.mrb[6].mxu0 }
 0x331   : > { %v677_v47 = vpack.c.bf16 %v672_v44, %v672_v44  ;;  %v923_v48 = vpop.f32.mrb[7].mxu0 }
 0x333   : > { %678 = vst [vmem:[%s337_s20] sm:$0xf] %v677_v47 }
 0x334   : > { %1156 = shalt.err (!%p1153_p4)
}
 0x335   : > { %s1157_s8 = scalar_lea.hbm %s1533_s21, 64  ;;  %s1161_s11 = scalar_lea.hbm %s1584_s7, 128 }
 0x336   : > { %p1158_p0 = scmp.ne.s32.totalorder %s1533_s21, %s1157_s8  ;;  %p1162_p8 = scmp.lt.u32.totalorder %s1533_s21, %s1584_s7 }
 0x337   : > { %p1163_p13 = scmp.lt.u32.totalorder %s1161_s11, %s1157_s8  ;;  %p1165_p10 = scmp.lt.u32.totalorder %s1157_s8, %s1533_s21 }
 0x338   : > { %p1159_p9 = pnand %p1158_p0, %p1422_p5 }
 0x339   : > { %p1164_p6 = por %p1163_p13, %p1162_p8 }
 0x33a   : > { %p1160_p11 = pneg %p1159_p9 }
 0x33b   : > { %p1166_p3 = por %p1165_p10, %p1164_p6 }
 0x33d   : > { %p1167_p7 = pnand %p1166_p3, %p1160_p11 }
 0x33f   : > { %1170 = shalt.err (!%p1167_p7)
}
 0x340   : > { %938 = dma.vmem_to_hbm [thread:$0]  (%p1422_p5), %s1535_s15, 64, %s1533_s21, %s680_s28  }
 0x341 PF: > { %s1604_s20 = sld [smem:[#allocation15_spill]]  ;;  %s705_s29 = sand.u32 1, %s1205_s24  }
 0x342   : > { %p1606_p1 = scmp.ge.s32.totalorder %s1217_s27, 2  ;;  %s706_s12 = scalar_lea.sflag [#allocation4], %s705_s29 }
 0x347   : > { %p1605_p12 = scmp.ne.s32.totalorder %s1604_s20, 0 }
 0x349   : > { %p955_p2 = pnand %p1606_p1, %p1605_p12 }
 0x34b   : > { %1200 = dma.done.wait (!%p955_p2), %s706_s12, 64  }
 0x34c   : > { %1202 = vsyncadd (!%p955_p2), %s706_s12, 4294967232  ;;  %p22_p4 = scmp.ge.s32.totalorder %s1408_s22, 4   ;;  %s1607_s24 = smov %s1209_s25 }
 0x34d   : > { %s1608_s25 = smov %s1213_s26  ;;  %s1609_s26 = smov %s1418_s18 }
 0x34e   : > { %s1610_s27 = smov %s1408_s22  ;;  %24 = sbr.rel (!%p22_p4) target bundleno = 7 (0x7), region = 105 }
 0x355   :  { %711 = vsyncpa [#allocation3], 1 }
 0x356   :  { %713 = vsyncpa [#allocation3 + $0x1], 1 }
 0x357   :  { %714 = vsyncpa [#allocation6], 1 }
 0x358   :  { %715 = vsyncpa [#allocation9], 1 }
 0x359   :  { %716 = vsyncpa [#allocation4], 1 }
 0x35a   :  { %718 = vsyncpa [#allocation4 + $0x1], 1 }

</bundles_post_ra>
